<compile_context>
chip_gen: v7x
topology: tpu7x:2x2x1
jax: 0.10.0
libtpu: 0.0.40
codegen_flags: <defaults>
</compile_context>

<pallas_src>
import jax
import jax.numpy as jnp
from jax.experimental import pallas as pl
from jax.experimental.pallas import tpu as pltpu

# ---------------- hyper-params (small, consistent with a TextCNN) ----------------
B = 8            # batch
L = 16           # sequence length (maxlen)
E = 32           # embedding dim
C = 32           # filters per kernel size
KS = (3, 4, 5)   # kernel sizes
KMAX = max(KS)
NUM_CLASSES = 2
VOCAB = 100
BL = B * L       # 128 rows -> maps cleanly onto (8,128) tiles
NF = len(KS) * C # 96 fused conv channels

# bf16 matmul operands / f32 accumulation: best on v6e/v7x, still fine on v5e's MXU.
# Set to jnp.float32 for bit-tight f32 parity if desired.
COMPUTE_DTYPE = jnp.bfloat16


def _textcnn_kernel(tok_ref, emb_ref, wconv_ref, bconv_ref, mask_ref,
                    wfc_ref, bfc_ref, out_ref):
    """Whole forward in one gridless kernel, everything resident in VMEM."""
    # 1) embedding gather fused in-kernel: one-hot(BL, VOCAB) @ table (exact in f32)
    tok = tok_ref[...]                                              # (BL, 1) int32
    vocab_iota = jax.lax.broadcasted_iota(jnp.int32, (BL, VOCAB), 1)
    onehot = (tok == vocab_iota).astype(jnp.float32)                # (BL, VOCAB)
    emb = jnp.dot(onehot, emb_ref[...],
                  preferred_element_type=jnp.float32)               # (BL, E)

    # 2) windowed input (BL, KMAX*E): piece o holds emb[row + o] (zeros past end).
    #    Rows that cross a batch boundary only ever feed *invalid* window positions
    #    (branch-k weight rows for o >= k are zero), which pool_mask zeroes below,
    #    so no per-offset masking is needed.
    emb_pad = jnp.concatenate(
        [emb, jnp.zeros((KMAX - 1, E), jnp.float32)], axis=0)       # (BL+KMAX-1, E)
    pieces = [emb_pad[o:o + BL, :] for o in range(KMAX)]
    xwin = jnp.concatenate(pieces, axis=-1)                         # (BL, KMAX*E)

    # 3) all three conv branches as ONE MXU matmul: M=128, K=KMAX*E=160, N=3*C=96
    conv = jnp.dot(xwin.astype(COMPUTE_DTYPE), wconv_ref[...],
                   preferred_element_type=jnp.float32)              # (BL, NF) f32
    conv = jnp.maximum(conv + bconv_ref[...], 0.0)                  # fused bias + ReLU
    # zero invalid tail positions (safe post-ReLU: valid activations are >= 0),
    # then global max-pool over time per branch.
    conv = conv.reshape(B, L, NF) * mask_ref[...][None, :, :]
    feats = jnp.max(conv, axis=1)                                   # (B, NF)

    # 4) final linear
    logits = jnp.dot(feats, wfc_ref[...],
                     preferred_element_type=jnp.float32) + bfc_ref[...]
    out_ref[...] = logits.astype(out_ref.dtype)


def prepare_fused_params(params):
    """One-time (offline) weight packing: fuse the three conv branches into a single
    (KMAX*E, 3*C) slab with zero rows where a branch's kernel is shorter, fuse the
    biases, and precompute the valid-window pooling mask."""
    wblocks, bblocks = [], []
    for k, wkey, bkey in ((KS[0], "w3", "b3"), (KS[1], "w4", "b4"), (KS[2], "w5", "b5")):
        w = params[wkey]                                            # (k, E, C)
        w = jnp.concatenate(
            [w, jnp.zeros((KMAX - k, E, C), w.dtype)], axis=0)      # (KMAX, E, C)
        wblocks.append(w.reshape(KMAX * E, C))
        bblocks.append(params[bkey])                                # (1, C)
    valid_len = jnp.repeat(
        jnp.array([L - k + 1 for k in KS], jnp.int32), C)           # (NF,)
    pool_mask = (jnp.arange(L, dtype=jnp.int32)[:, None]
                 < valid_len[None, :]).astype(jnp.float32)          # (L, NF)
    return {
        "embedding": params["embedding"].astype(jnp.float32),       # (VOCAB, E)
        "w_conv": jnp.concatenate(wblocks, axis=1).astype(COMPUTE_DTYPE),  # (KMAX*E, NF)
        "b_conv": jnp.concatenate(bblocks, axis=1).astype(jnp.float32),    # (1, NF)
        "pool_mask": pool_mask,                                     # (L, NF)
        "w_fc": params["wfc"].astype(jnp.float32),                  # (NF, NUM_CLASSES)
        "b_fc": params["bfc"].reshape(1, NUM_CLASSES).astype(jnp.float32),
    }


@jax.jit
def textcnn_forward(tokens, fused):
    tok2 = tokens.reshape(BL, 1).astype(jnp.int32)                  # 128 rows, 1 lane
    ins = (tok2, fused["embedding"], fused["w_conv"], fused["b_conv"],
           fused["pool_mask"], fused["w_fc"], fused["b_fc"])
    return pl.pallas_call(
        _textcnn_kernel,
        out_shape=jax.ShapeDtypeStruct((B, NUM_CLASSES), jnp.float32),
        in_specs=[pl.BlockSpec(memory_space=pltpu.MemorySpace.VMEM) for _ in ins],
        out_specs=pl.BlockSpec(memory_space=pltpu.MemorySpace.VMEM),
    )(*ins)


def init_params(key):
    ks = jax.random.split(key, 9)
    scale = 0.1
    return {
        "embedding": scale * jax.random.normal(ks[0], (VOCAB, E), jnp.float32),
        "w3": scale * jax.random.normal(ks[1], (KS[0], E, C), jnp.float32),
        "b3": jnp.zeros((1, C), jnp.float32),
        "w4": scale * jax.random.normal(ks[2], (KS[1], E, C), jnp.float32),
        "b4": jnp.zeros((1, C), jnp.float32),
        "w5": scale * jax.random.normal(ks[3], (KS[2], E, C), jnp.float32),
        "b5": jnp.zeros((1, C), jnp.float32),
        "wfc": scale * jax.random.normal(ks[4], (3 * C, NUM_CLASSES), jnp.float32),
        "bfc": jnp.zeros((NUM_CLASSES,), jnp.float32),
    }


def _reference_forward(tokens, params):
    """Pure-JAX f32 reference with the original (unfused) semantics."""
    x = params["embedding"][tokens].astype(jnp.float32)
    feats = []
    for k, wkey, bkey in ((KS[0], "w3", "b3"), (KS[1], "w4", "b4"), (KS[2], "w5", "b5")):
        lout = L - k + 1
        acc = jnp.zeros((B, lout, C), jnp.float32)
        for o in range(k):
            acc = acc + jnp.einsum("ble,ec->blc", x[:, o:o + lout, :], params[wkey][o])
        acc = jnp.maximum(acc + params[bkey][None, :, :], 0.0)
        feats.append(jnp.max(acc, axis=1))
    h = jnp.concatenate(feats, axis=-1)
    return h @ params["wfc"] + params["bfc"]


if __name__ == "__main__":
    key = jax.random.PRNGKey(0)
    pkey, tkey = jax.random.split(key)
    params = init_params(pkey)
    fused = prepare_fused_params(params)
    tokens = jax.random.randint(tkey, (B, L), 0, VOCAB, dtype=jnp.int32)

    out = jax.block_until_ready(textcnn_forward(tokens, fused))
    ref = _reference_forward(tokens, params)
    assert out.shape == (B, NUM_CLASSES)
    # bf16 matmul operands with f32 accumulation -> expected |err| ~1e-3 vs f32 ref.
    assert jnp.allclose(out, ref, atol=2e-2, rtol=2e-2)

    # TODO(synk): BaseModel's training / checkpointing / weighted-ensembling utilities
    # (fit, predict_generator, optimizer selection) are host-side logic with no Pallas
    # equivalent and are intentionally not kernelized.
    print("KERNEL_OK")
</pallas_src>

<mosaic_0001>
module attributes {stable_mosaic.version = 11 : i64} {
  func.func @_textcnn_kernel(%arg0: memref<128x1xi32, #tpu.memory_space<vmem>>, %arg1: memref<100x32xf32, #tpu.memory_space<vmem>>, %arg2: memref<160x96xbf16, #tpu.memory_space<vmem>>, %arg3: memref<1x96xf32, #tpu.memory_space<vmem>>, %arg4: memref<16x96xf32, #tpu.memory_space<vmem>>, %arg5: memref<96x2xf32, #tpu.memory_space<vmem>>, %arg6: memref<1x2xf32, #tpu.memory_space<vmem>>, %arg7: memref<8x2xf32, #tpu.memory_space<vmem>>) attributes {dimension_semantics = [], scalar_prefetch = 0 : i64, scratch_operands = 0 : i64, tpu.core_type = #tpu.core_type<tc>} {
    %c0 = arith.constant 0 : index
    %c0_0 = arith.constant 0 : index
    %0 = vector.load %arg0[%c0, %c0_0] : memref<128x1xi32, #tpu.memory_space<vmem>>, vector<128x1xi32>
    %1 = tpu.iota {dimensions = array<i32: 1>} : vector<128x100xi32>
    %2 = vector.broadcast %0 : vector<128x1xi32> to vector<128x100xi32>
    %3 = arith.cmpi eq, %2, %1 : vector<128x100xi32>
    %4 = arith.extui %3 : vector<128x100xi1> to vector<128x100xi32>
    %5 = arith.sitofp %4 : vector<128x100xi32> to vector<128x100xf32>
    %c0_1 = arith.constant 0 : index
    %c0_2 = arith.constant 0 : index
    %6 = vector.load %arg1[%c0_1, %c0_2] : memref<100x32xf32, #tpu.memory_space<vmem>>, vector<100x32xf32>
    %cst = arith.constant dense<0.000000e+00> : vector<128x32xf32>
    %7 = tpu.matmul %5, %6, %cst {dimension_numbers = #tpu.dot_dimension_numbers<[1], [0], [0], [1], [0, 0, 1, 1], [], []>} : vector<128x100xf32>, vector<100x32xf32>, vector<128x32xf32> -> vector<128x32xf32>
    %cst_3 = arith.constant 0.000000e+00 : f32
    %8 = vector.broadcast %cst_3 : f32 to vector<4x32xf32>
    %9 = tpu.concatenate %7, %8 in 0 : vector<128x32xf32>, vector<4x32xf32> -> vector<132x32xf32>
    %10 = vector.extract_strided_slice %9 {offsets = [0, 0], sizes = [128, 32], strides = [1, 1]} : vector<132x32xf32> to vector<128x32xf32>
    %11 = vector.extract_strided_slice %9 {offsets = [1, 0], sizes = [128, 32], strides = [1, 1]} : vector<132x32xf32> to vector<128x32xf32>
    %12 = vector.extract_strided_slice %9 {offsets = [2, 0], sizes = [128, 32], strides = [1, 1]} : vector<132x32xf32> to vector<128x32xf32>
    %13 = vector.extract_strided_slice %9 {offsets = [3, 0], sizes = [128, 32], strides = [1, 1]} : vector<132x32xf32> to vector<128x32xf32>
    %14 = vector.extract_strided_slice %9 {offsets = [4, 0], sizes = [128, 32], strides = [1, 1]} : vector<132x32xf32> to vector<128x32xf32>
    %15 = tpu.concatenate %10, %11, %12, %13, %14 in 1 : vector<128x32xf32>, vector<128x32xf32>, vector<128x32xf32>, vector<128x32xf32>, vector<128x32xf32> -> vector<128x160xf32>
    %16 = arith.truncf %15 : vector<128x160xf32> to vector<128x160xbf16>
    %c0_4 = arith.constant 0 : index
    %c0_5 = arith.constant 0 : index
    %17 = vector.load %arg2[%c0_4, %c0_5] : memref<160x96xbf16, #tpu.memory_space<vmem>>, vector<160x96xbf16>
    %cst_6 = arith.constant dense<0.000000e+00> : vector<128x96xf32>
    %18 = tpu.matmul %16, %17, %cst_6 {dimension_numbers = #tpu.dot_dimension_numbers<[1], [0], [0], [1], [0, 0, 1, 1], [], []>} : vector<128x160xbf16>, vector<160x96xbf16>, vector<128x96xf32> -> vector<128x96xf32>
    %c0_7 = arith.constant 0 : index
    %c0_8 = arith.constant 0 : index
    %19 = vector.load %arg3[%c0_7, %c0_8] : memref<1x96xf32, #tpu.memory_space<vmem>>, vector<1x96xf32>
    %20 = vector.broadcast %19 : vector<1x96xf32> to vector<128x96xf32>
    %21 = arith.addf %18, %20 : vector<128x96xf32>
    %cst_9 = arith.constant 0.000000e+00 : f32
    %22 = vector.broadcast %cst_9 : f32 to vector<128x96xf32>
    %23 = arith.maximumf %21, %22 : vector<128x96xf32>
    %24 = vector.shape_cast %23 : vector<128x96xf32> to vector<8x16x96xf32>
    %c0_10 = arith.constant 0 : index
    %c0_11 = arith.constant 0 : index
    %25 = vector.load %arg4[%c0_10, %c0_11] : memref<16x96xf32, #tpu.memory_space<vmem>>, vector<16x96xf32>
    %26 = vector.shape_cast %25 : vector<16x96xf32> to vector<1x16x96xf32>
    %27 = vector.broadcast %26 : vector<1x16x96xf32> to vector<8x16x96xf32>
    %28 = arith.mulf %24, %27 : vector<8x16x96xf32>
    %cst_12 = arith.constant dense<0xFF800000> : vector<8x96xf32>
    %29 = vector.multi_reduction <maximumf>, %28, %cst_12 [1] : vector<8x16x96xf32> to vector<8x96xf32>
    %c0_13 = arith.constant 0 : index
    %c0_14 = arith.constant 0 : index
    %30 = vector.load %arg5[%c0_13, %c0_14] : memref<96x2xf32, #tpu.memory_space<vmem>>, vector<96x2xf32>
    %cst_15 = arith.constant dense<0.000000e+00> : vector<8x2xf32>
    %31 = tpu.matmul %29, %30, %cst_15 {dimension_numbers = #tpu.dot_dimension_numbers<[1], [0], [0], [1], [0, 0, 1, 1], [], []>} : vector<8x96xf32>, vector<96x2xf32>, vector<8x2xf32> -> vector<8x2xf32>
    %c0_16 = arith.constant 0 : index
    %c0_17 = arith.constant 0 : index
    %32 = vector.load %arg6[%c0_16, %c0_17] : memref<1x2xf32, #tpu.memory_space<vmem>>, vector<1x2xf32>
    %33 = vector.broadcast %32 : vector<1x2xf32> to vector<8x2xf32>
    %34 = arith.addf %31, %33 : vector<8x2xf32>
    %c0_18 = arith.constant 0 : index
    %c0_19 = arith.constant 0 : index
    %35 = vector.load %arg7[%c0_18, %c0_19] : memref<8x2xf32, #tpu.memory_space<vmem>>, vector<8x2xf32>
    tpu.vector_store %arg7[%c0_18, %c0_19], %34 {strides = array<i32>} : memref<8x2xf32, #tpu.memory_space<vmem>>, vector<8x2xf32>,
    return
  }
}

</mosaic_0001>

<bundles_post_ra>
// kernel: textcnn_forward.1
= control target key start
LH: loop header
LB: loop body
LE: loop exit
PB: predicated region body
PF: predicated region fallthrough
CT: control target
= control target key end

     0   :  { %v1518_v0 = vmov 0   ;;  %vm203_vm0 = vcmask 1043456   ;;  %v43_v36 = vlaneseq  ;;  %vm154_vm1 = vcmask 818176   ;;  %s1521_s8 = smov 32   ;;  %s1522_s9 = smov 96   ;;  %s2238_s0 = inlined_call_operand.vmem [shape: s32[128,1], index: 0, kind: input, shape index: {}]   ;;  %s2239_s1 = inlined_call_operand.vmem [shape: f32[100,32], index: 1, kind: input, shape index: {}]   ;;  %s2240_s2 = inlined_call_operand.vmem [shape: bf16[160,96], index: 2, kind: input, shape index: {}]   ;;  %s2241_s5 = inlined_call_operand.vmem [shape: f32[96,2], index: 5, kind: input, shape index: {}]   ;;  %s2242_s3 = inlined_call_operand.vmem [shape: f32[1,96], index: 3, kind: input, shape index: {}]   ;;  %s2243_s4 = inlined_call_operand.vmem [shape: f32[16,96], index: 4, kind: input, shape index: {}]   ;;  %s2244_s6 = inlined_call_operand.vmem [shape: f32[1,2], index: 6, kind: input, shape index: {}]   ;;  %s2245_s7 = inlined_call_operand.vmem [shape: f32[8,2], index: 7, kind: output, shape index: {}]  }
   0x1   :  { %1387 = vset.pattern.permute.xlu1 %v1518_v0  ;;  %1386 = vset.pattern.permute.xlu0 %v1518_v0  ;;  %v29_v1 = vld [vmem:[%s2238_s0 + $0x10] sm:$0xff]  ;;  %v27_v2 = vld [vmem:[%s2238_s0] sm:$0xff]  ;;  %v30_v3 = vld [vmem:[%s2238_s0 + $0x18] sm:$0xff]  ;;  %v2246_v40 = vmov 0.0  }
   0x2   :  { %52 = vperm.xlu1 %1387, %v29_v1   ;;  %46 = vperm.xlu0 %1386, %v27_v2   ;;  %v28_v4 = vld [vmem:[%s2238_s0 + $0x8] sm:$0xff]  ;;  %v141_v6 = vld [vmem:[%s2239_s1] sm:$0xff]  ;;  %v143_v10 = vld [vmem:[%s2239_s1 + $0x10] sm:$0xff]  ;;  %v1657_v37 = vand.u32 127, %v43_v36 }
   0x3   :  { %842 = vmatprep.subr.bf16.mxu1 %v1518_v0  ;;  %v32_v5 = vld [vmem:[%s2238_s0 + $0x28] sm:$0xff]  ;;  %v31_v8 = vld [vmem:[%s2238_s0 + $0x20] sm:$0xff]  ;;  %v144_v11 = vld [vmem:[%s2239_s1 + $0x18] sm:$0xff] }
   0x4   :  { %v142_v7 = vld [vmem:[%s2239_s1 + $0x8] sm:$0xff]  ;;  %v1341_v12 = vpack.c.bf16 %v144_v11, %v143_v10  ;;  %v145_v13 = vld [vmem:[%s2239_s1 + $0x20] sm:$0xff]  ;;  %v34_v15 = vld [vmem:[%s2238_s0 + $0x38] sm:$0xff] }
   0x5   :  { %v1337_v9 = vpack.c.bf16 %v142_v7, %v141_v6  ;;  %v146_v14 = vld [vmem:[%s2239_s1 + $0x28] sm:$0xff]  ;;  %v33_v16 = vld [vmem:[%s2238_s0 + $0x30] sm:$0xff]  ;;  %v148_v19 = vld [vmem:[%s2239_s1 + $0x38] sm:$0xff] }
   0x6   :  { %55 = vperm.xlu1 %1387, %v30_v3   ;;  %49 = vperm.xlu0 %1386, %v28_v4   ;;  %v1345_v17 = vpack.c.bf16 %v146_v14, %v145_v13  ;;  %v147_v18 = vld [vmem:[%s2239_s1 + $0x30] sm:$0xff]  ;;  %v36_v20 = vld [vmem:[%s2238_s0 + $0x48] sm:$0xff]  ;;  %v35_v21 = vld [vmem:[%s2238_s0 + $0x40] sm:$0xff] }
   0x7   :  { %1338 = vmatprep.subr.bf16.mxu0 %v1337_v9  ;;  %v1349_v22 = vpack.c.bf16 %v148_v19, %v147_v18  ;;  %v149_v23 = vld [vmem:[%s2239_s1 + $0x40] sm:$0xff]  ;;  %v150_v24 = vld [vmem:[%s2239_s1 + $0x48] sm:$0xff]  ;;  %v38_v25 = vld [vmem:[%s2238_s0 + $0x58] sm:$0xff] }
   0x8   :  { %1340 = vmatpush3.bf16.msra.mxu0 %v1337_v9  ;;  %v37_v26 = vld [vmem:[%s2238_s0 + $0x50] sm:$0xff]  ;;  %v1353_v27 = vpack.c.bf16 %v150_v24, %v149_v23  ;;  %v152_v29 = vld [vmem:[%s2239_s1 + $0x58] sm:$0xff]  ;;  %v40_v30 = vld [vmem:[%s2238_s0 + $0x68] sm:$0xff] }
   0x9   :  { %1342 = vmatprep.subr.bf16.mxu0 %v1341_v12  ;;  %v151_v28 = vld [vmem:[%s2239_s1 + $0x50] sm:$0xff]  ;;  %v39_v31 = vld [vmem:[%s2238_s0 + $0x60] sm:$0xff]  ;;  %v42_v33 = vld [vmem:[%s2238_s0 + $0x78] sm:$0xff] }
   0xa   :  { %61 = vperm.xlu1 %1387, %v32_v5   ;;  %58 = vperm.xlu0 %1386, %v31_v8   ;;  %v1357_v32 = vpack.c.bf16 %v152_v29, %v151_v28  ;;  %v41_v34 = vld [vmem:[%s2238_s0 + $0x70] sm:$0xff]  ;;  %v153_v35 = vld [vmem:[%s2239_s1 + $0x60] sm:$0xf]  ;;  %v1509_v9 = vld [vmem:[%s2240_s2 + $0x8] sm:$0xff]  }
   0xb   :  { %v1508_v8 = vld [vmem:[%s2240_s2] sm:$0xff]   ;;  %v1510_v10 = vld [vmem:[%s2240_s2 + $0x10] sm:$0xff]   ;;  %v1511_v11 = vld [vmem:[%s2240_s2 + $0x18] sm:$0xff]  }
   0xc   :  { %1344 = vmatpush3.bf16.msra.mxu0 %v1341_v12  ;;  %843 = vmatpush1.bf16.msra.mxu1 %v1508_v8  ;;  %v1512_v12 = vld [vmem:[%s2240_s2 + $0x20] sm:$0xff]   ;;  %v1513_v13 = vld [vmem:[%s2240_s2 + $0x28] sm:$0xff]   ;;  %v1514_v14 = vld [vmem:[%s2240_s2 + $0x30] sm:$0xff]  }
   0xd   :  { %1346 = vmatprep.subr.bf16.mxu0 %v1345_v17  ;;  %844 = vmatprep.subr.bf16.mxu1 %v1518_v0 }
   0xe   :  { %67 = vperm.xlu1 %1387, %v34_v15   ;;  %64 = vperm.xlu0 %1386, %v33_v16   ;;  %v1515_v15 = vld [vmem:[%s2240_s2 + $0x38] sm:$0xff]  }
  0x10   :  { %1348 = vmatpush3.bf16.msra.mxu0 %v1345_v17  ;;  %845 = vmatpush1.bf16.msra.mxu1 %v1509_v9 }
  0x11   :  { %1350 = vmatprep.subr.bf16.mxu0 %v1349_v22  ;;  %846 = vmatprep.subr.bf16.mxu1 %v1518_v0 }
  0x12   :  { %73 = vperm.xlu1 %1387, %v36_v20   ;;  %70 = vperm.xlu0 %1386, %v35_v21  }
  0x14   :  { %1352 = vmatpush3.bf16.msra.mxu0 %v1349_v22  ;;  %847 = vmatpush1.bf16.msra.mxu1 %v1510_v10 }
  0x15   :  { %1354 = vmatprep.subr.bf16.mxu0 %v1353_v27  ;;  %848 = vmatprep.subr.bf16.mxu1 %v1518_v0 }
  0x16   :  { %79 = vperm.xlu1 %1387, %v38_v25   ;;  %76 = vperm.xlu0 %1386, %v37_v26   ;;  %v1516_v26 = vld [vmem:[%s2240_s2 + $0x40] sm:$0xff]  }
  0x18   :  { %1356 = vmatpush3.bf16.msra.mxu0 %v1353_v27  ;;  %849 = vmatpush1.bf16.msra.mxu1 %v1511_v11 }
  0x19   :  { %1358 = vmatprep.subr.bf16.mxu0 %v1357_v32  ;;  %850 = vmatprep.subr.bf16.mxu1 %v1518_v0 }
  0x1a   :  { %85 = vperm.xlu1 %1387, %v40_v30   ;;  %82 = vperm.xlu0 %1386, %v39_v31  }
  0x1c   :  { %1360 = vmatpush3.bf16.msra.mxu0 %v1357_v32  ;;  %851 = vmatpush1.bf16.msra.mxu1 %v1512_v12 }
  0x1d   :  { %1284 = vmatprep.subr.msk.mxu0 %vm203_vm0, %v153_v35  ;;  %852 = vmatprep.subr.bf16.mxu1 %v1518_v0 }
  0x1e   :  { %91 = vperm.xlu1 %1387, %v42_v33   ;;  %88 = vperm.xlu0 %1386, %v41_v34   ;;  %v1765_v33 = vrot.slane %v2246_v40, 1  ;;  %v1768_v34 = vrot.slane %v2246_v40, 3 }
  0x20   :  { %1285 = vmatpush3.msk.msra.mxu0 %vm203_vm0, %v153_v35  ;;  %853 = vmatpush1.bf16.msra.mxu1 %v1513_v13 }
  0x21   :  { %854 = vmatprep.subr.bf16.mxu1 %v1518_v0 }
  0x24   :  { %855 = vmatpush1.bf16.msra.mxu1 %v1514_v14 }
  0x25   :  { %856 = vmatprep.subr.bf16.mxu1 %v1518_v0 }
  0x28   :  { %857 = vmatpush1.bf16.msra.mxu1 %v1515_v15 }
  0x29   :  { %858 = vmatprep.subr.bf16.mxu1 %v1518_v0 }
  0x2c   :  { %859 = vmatpush1.bf16.msra.mxu1 %v1516_v26 }
  0x2d   :  { %860 = vmatprep.subr.bf16.mxu1 %v1518_v0 }
  0x81   :  { %v53_v38 = vpop.permute.xlu1 %52  ;;  %v47_v39 = vpop.permute.xlu0 %46 }
  0x82   :  { %vm93_vm2 = vcmp.eq.s32.totalorder %v47_v39, %v1657_v37  ;;  %vm95_vm3 = vcmp.eq.s32.totalorder %v53_v38, %v1657_v37  ;;  %v1517_v39 = vld [vmem:[%s2240_s2 + $0x48] sm:$0xff]   ;;  %s1520_s2 = smov 64  }
  0x83   :  { %v1164_v41 = vsel %vm93_vm2, 1.0, %v2246_v40  ;;  %v1166_v44 = vsel %vm95_vm3, 1.0, %v2246_v40  ;;  %861 = vmatpush1.bf16.msra.mxu1 %v1517_v39 }
  0x84   :  { %1286 = vmatprep.mubr.msk.f32.mxu0 %vm154_vm1, %v1164_v41 }
  0x85   :  { %v56_v42 = vpop.permute.xlu1 %55  ;;  %v50_v43 = vpop.permute.xlu0 %49 }
  0x86   :  { %vm94_vm4 = vcmp.eq.s32.totalorder %v50_v43, %v1657_v37  ;;  %vm96_vm5 = vcmp.eq.s32.totalorder %v56_v42, %v1657_v37  ;;  %v1781_v43 = vrot.slane %v2246_v40, 2 }
  0x87   :  { %v1165_v45 = vsel %vm94_vm4, 1.0, %v2246_v40  ;;  %v1167_v48 = vsel %vm96_vm5, 1.0, %v2246_v40  ;;  %vm369_vm4 = vcmask 1046528   ;;  %vm533_vm5 = vcmask 1044480  }
  0x88   :  { %1287 = vmatmul.mubr.msk.f32.vlgmr.msra.gmra.mrb[0].mxu0 %vm154_vm1, %v1165_v45 }
  0x89   :  { %v62_v46 = vpop.permute.xlu1 %61  ;;  %1289 = vmatprep.mubr.msk.f32.mxu0 %vm154_vm1, %v1166_v44  ;;  %v59_v47 = vpop.permute.xlu0 %58  ;;  %v1784_v44 = vrot.slane %v2246_v40, 4 }
  0x8a   :  { %vm97_vm6 = vcmp.eq.s32.totalorder %v59_v47, %v1657_v37  ;;  %vm98_vm7 = vcmp.eq.s32.totalorder %v62_v46, %v1657_v37 }
  0x8b   :  { %v1168_v49 = vsel %vm97_vm6, 1.0, %v2246_v40  ;;  %v1169_v52 = vsel %vm98_vm7, 1.0, %v2246_v40  ;;  %vm664_vm6 = vcmask 261120   ;;  %vm698_vm7 = vcmask 785408  }
  0x8c   :  { %1290 = vmatmul.mubr.msk.f32.gmra.mrb[2].mxu0 %vm154_vm1, %v1167_v48 }
  0x8d   :  { %v68_v50 = vpop.permute.xlu1 %67  ;;  %1292 = vmatprep.mubr.msk.f32.mxu0 %vm154_vm1, %v1168_v49  ;;  %v65_v51 = vpop.permute.xlu0 %64 }
  0x8e   :  { %vm99_vm8 = vcmp.eq.s32.totalorder %v65_v51, %v1657_v37  ;;  %vm100_vm9 = vcmp.eq.s32.totalorder %v68_v50, %v1657_v37 }
  0x8f   :  { %v1170_v53 = vsel %vm99_vm8, 1.0, %v2246_v40  ;;  %v1171_v56 = vsel %vm100_vm9, 1.0, %v2246_v40  ;;  %vm1524_vm8 = vmmov 0   ;;  %vm1072_vm9 = vcmask 1041409  }
  0x90   :  { %1293 = vmatmul.mubr.msk.f32.gmra.mrb[4].mxu0 %vm154_vm1, %v1169_v52 }
  0x91   :  { %v74_v54 = vpop.permute.xlu1 %73  ;;  %1295 = vmatprep.mubr.msk.f32.mxu0 %vm154_vm1, %v1170_v53  ;;  %v71_v55 = vpop.permute.xlu0 %70 }
  0x92   :  { %vm101_vm10 = vcmp.eq.s32.totalorder %v71_v55, %v1657_v37  ;;  %vm102_vm11 = vcmp.eq.s32.totalorder %v74_v54, %v1657_v37 }
  0x93   :  { %v1172_v57 = vsel %vm101_vm10, 1.0, %v2246_v40  ;;  %v1173_v60 = vsel %vm102_vm11, 1.0, %v2246_v40  ;;  %vm1074_vm10 = vcmask 1042434   ;;  %vm1076_vm11 = vcmask 1043459  }
  0x94   :  { %1296 = vmatmul.mubr.msk.f32.gmra.mrb[6].mxu0 %vm154_vm1, %v1171_v56 }
  0x95   :  { %v80_v58 = vpop.permute.xlu1 %79  ;;  %1298 = vmatprep.mubr.msk.f32.mxu0 %vm154_vm1, %v1172_v57  ;;  %v77_v59 = vpop.permute.xlu0 %76 }
  0x96   :  { %vm103_vm12 = vcmp.eq.s32.totalorder %v77_v59, %v1657_v37  ;;  %vm104_vm13 = vcmp.eq.s32.totalorder %v80_v58, %v1657_v37 }
  0x97   :  { %v1174_v61 = vsel %vm103_vm12, 1.0, %v2246_v40  ;;  %v1175_v1 = vsel %vm104_vm13, 1.0, %v2246_v40  ;;  %vm1078_vm12 = vcmask 1044484   ;;  %vm1080_vm13 = vcmask 1045509  }
  0x98   :  { %1299 = vmatmul.mubr.msk.f32.gmra.mrb[8].mxu0 %vm154_vm1, %v1173_v60 }
  0x99   :  { %v86_v62 = vpop.permute.xlu1 %85  ;;  %1301 = vmatprep.mubr.msk.f32.mxu0 %vm154_vm1, %v1174_v61  ;;  %v83_v63 = vpop.permute.xlu0 %82 }
  0x9a   :  { %vm105_vm14 = vcmp.eq.s32.totalorder %v83_v63, %v1657_v37  ;;  %vm106_vm15 = vcmp.eq.s32.totalorder %v86_v62, %v1657_v37 }
  0x9b   :  { %v1176_v2 = vsel %vm105_vm14, 1.0, %v2246_v40  ;;  %v1177_v5 = vsel %vm106_vm15, 1.0, %v2246_v40  ;;  %vm1082_vm14 = vcmask 1046534   ;;  %vm1084_vm15 = vcmask 1047559  }
  0x9c   :  { %1302 = vmatmul.mubr.msk.f32.gmra.mrb[10].mxu0 %vm154_vm1, %v1175_v1 }
  0x9d   :  { %v92_v3 = vpop.permute.xlu1 %91  ;;  %1304 = vmatprep.mubr.msk.f32.mxu0 %vm154_vm1, %v1176_v2  ;;  %v89_v4 = vpop.permute.xlu0 %88 }
  0x9e   :  { %vm107_vm2 = vcmp.eq.s32.totalorder %v89_v4, %v1657_v37  ;;  %vm108_vm3 = vcmp.eq.s32.totalorder %v92_v3, %v1657_v37 }
  0x9f   :  { %v1178_v6 = vsel %vm107_vm2, 1.0, %v2246_v40  ;;  %v1179_v7 = vsel %vm108_vm3, 1.0, %v2246_v40  ;;  %vm1158_vm2 = vcmask 15360  }
  0xa0   :  { %1305 = vmatmul.mubr.msk.f32.gmra.mrb[12].mxu0 %vm154_vm1, %v1177_v5 }
  0xa1   :  { %1307 = vmatprep.mubr.msk.f32.mxu0 %vm154_vm1, %v1178_v6 }
  0xa4   :  { %1308 = vmatmul.mubr.msk.f32.gmra.mrb[14].mxu0 %vm154_vm1, %v1179_v7  ;;  %vm451_vm1 = vcmask 1045504  }
 0x15b   :  { %v1739_v16 = vpop.f32.mrb[0].mxu0 }
 0x15c   :  { %v371_v17 = vrot.slane %v1739_v16, 1  ;;  %v453_v18 = vrot.slane %v1739_v16, 2  ;;  %v535_v19 = vrot.slane %v1739_v16, 3  ;;  %v1744_v20 = vpop.f32.mrb[1].mxu0  ;;  %v616_v21 = vrot.slane %v1739_v16, 4 }
 0x15d   :  { %v370_v22 = vrot.slane %v1744_v20, 1  ;;  %v452_v23 = vrot.slane %v1744_v20, 2  ;;  %v534_v24 = vrot.slane %v1744_v20, 3  ;;  %v615_v25 = vrot.slane %v1744_v20, 4 }
 0x15f   :  { %v1754_v27 = vpop.f32.mrb[2].mxu0  ;;  %v617_v28 = vsel %vm203_vm0, %v615_v25, %v616_v21  ;;  %v454_v29 = vsel %vm451_vm1, %v452_v23, %v453_v18  ;;  %v372_v30 = vsel %vm369_vm4, %v370_v22, %v371_v17  ;;  %v1760_v31 = vsel %vm533_vm5, %v534_v24, %v535_v19 }
 0x160   :  { %v1762_v32 = vpop.f32.mrb[3].mxu0  ;;  %v375_v41 = vrot.slane %v1754_v27, 1  ;;  %v457_v42 = vrot.slane %v1754_v27, 2  ;;  %v539_v49 = vrot.slane %v1754_v27, 3  ;;  %v620_v50 = vrot.slane %v1754_v27, 4 }
 0x161   :  { %v373_v35 = vrot.slane %v1762_v32, 1  ;;  %v455_v36 = vrot.slane %v1762_v32, 2  ;;  %v537_v37 = vrot.slane %v1762_v32, 3  ;;  %v618_v38 = vrot.slane %v1762_v32, 4 }
 0x163   :  { %v1786_v45 = vpop.f32.mrb[4].mxu0  ;;  %v619_v0 = vsel %vm203_vm0, %v616_v21, %v618_v38  ;;  %v456_v46 = vsel %vm451_vm1, %v453_v18, %v455_v36  ;;  %v374_v47 = vsel %vm369_vm4, %v371_v17, %v373_v35  ;;  %v538_v48 = vsel %vm533_vm5, %v535_v19, %v537_v37 }
 0x164   :  { %v379_v51 = vrot.slane %v1786_v45, 1  ;;  %v461_v52 = vrot.slane %v1786_v45, 2  ;;  %v1798_v53 = vpop.f32.mrb[5].mxu0  ;;  %v543_v54 = vrot.slane %v1786_v45, 3  ;;  %v716_v58 = vpack.c.bf16 %v619_v0, %v617_v28 }
 0x165   :  { %v377_v55 = vrot.slane %v1798_v53, 1  ;;  %v459_v56 = vrot.slane %v1798_v53, 2  ;;  %v541_v57 = vrot.slane %v1798_v53, 3  ;;  %v1393_v59 = vpack.i.bf16 %v456_v46, %v454_v29 }
 0x166   :  { %v1388_v60 = vpack.i.bf16 %v374_v47, %v372_v30  ;;  %v1398_v61 = vpack.i.bf16 %v538_v48, %v1760_v31  ;;  %v376_v63 = vsel %vm369_vm4, %v373_v35, %v375_v41  ;;  %v458_v2 = vsel %vm451_vm1, %v455_v36, %v457_v42  ;;  %1208 = vmatprep.mubr.msk.bf16.mxu1 %vm664_vm6, %v716_v58 }
 0x167   :  { %v1805_v62 = vpop.f32.mrb[6].mxu0  ;;  %v378_v1 = vsel %vm369_vm4, %v375_v41, %v377_v55  ;;  %v460_v3 = vsel %vm451_vm1, %v457_v42, %v459_v56  ;;  %v624_v4 = vrot.slane %v1786_v45, 4  ;;  %v622_v5 = vrot.slane %v1798_v53, 4  ;;  %1394 = vrot.lane.b32.xlu1 %v1393_v59, %s1520_s2 }
 0x168   :  { %v383_v6 = vrot.slane %v1805_v62, 1  ;;  %v465_v7 = vrot.slane %v1805_v62, 2  ;;  %v1817_v8 = vpop.f32.mrb[7].mxu0  ;;  %1389 = vrot.lane.b32.xlu0 %v1388_v60, %s1521_s8  ;;  %v547_v9 = vrot.slane %v1805_v62, 3  ;;  %v1403_v13 = vpack.i.bf16 %v378_v1, %v376_v63 }
 0x169   :  { %v381_v10 = vrot.slane %v1817_v8, 1  ;;  %v463_v11 = vrot.slane %v1817_v8, 2  ;;  %v545_v12 = vrot.slane %v1817_v8, 3  ;;  %v1408_v14 = vpack.i.bf16 %v460_v3, %v458_v2 }
 0x16a   :  { %v540_v15 = vsel %vm533_vm5, %v537_v37, %v539_v49  ;;  %v542_v17 = vsel %vm533_vm5, %v539_v49, %v541_v57  ;;  %v462_v21 = vsel %vm451_vm1, %v459_v56, %v461_v52  ;;  %v380_v23 = vsel %vm369_vm4, %v377_v55, %v379_v51 }
 0x16b   :  { %v1826_v18 = vpop.f32.mrb[8].mxu0  ;;  %v1413_v19 = vpack.i.bf16 %v542_v17, %v540_v15  ;;  %v464_v22 = vsel %vm451_vm1, %v461_v52, %v463_v11  ;;  %v628_v24 = vrot.slane %v1805_v62, 4  ;;  %v626_v25 = vrot.slane %v1817_v8, 4  ;;  %1404 = vrot.lane.b32.xlu1 %v1403_v13, %s1521_s8 }
 0x16c   :  { %v387_v26 = vrot.slane %v1826_v18, 1  ;;  %v469_v28 = vrot.slane %v1826_v18, 2  ;;  %v1836_v29 = vpop.f32.mrb[9].mxu0  ;;  %1399 = vrot.lane.b32.xlu0 %v1398_v61, %s1522_s9  ;;  %v551_v30 = vrot.slane %v1826_v18, 3  ;;  %v1423_v37 = vpack.i.bf16 %v464_v22, %v462_v21 }
 0x16d   :  { %v385_v31 = vrot.slane %v1836_v29, 1  ;;  %v467_v35 = vrot.slane %v1836_v29, 2  ;;  %v549_v36 = vrot.slane %v1836_v29, 3  ;;  %v382_v39 = vsel %vm369_vm4, %v379_v51, %v381_v10 }
 0x16e   :  { %v544_v41 = vsel %vm533_vm5, %v541_v57, %v543_v54  ;;  %v546_v42 = vsel %vm533_vm5, %v543_v54, %v545_v12  ;;  %v1418_v46 = vpack.i.bf16 %v382_v39, %v380_v23  ;;  %v384_v48 = vsel %vm369_vm4, %v381_v10, %v383_v6 }
 0x16f   :  { %v1846_v0 = vpop.f32.mrb[10].mxu0  ;;  %v1428_v47 = vpack.i.bf16 %v546_v42, %v544_v41  ;;  %v386_v49 = vsel %vm369_vm4, %v383_v6, %v385_v31  ;;  %v632_v52 = vrot.slane %v1826_v18, 4  ;;  %v630_v55 = vrot.slane %v1836_v29, 4  ;;  %1414 = vrot.lane.b32.xlu1 %v1413_v19, %s1522_s9 }
 0x170   :  { %v391_v51 = vrot.slane %v1846_v0, 1  ;;  %v473_v56 = vrot.slane %v1846_v0, 2  ;;  %v1855_v57 = vpop.f32.mrb[11].mxu0  ;;  %1409 = vrot.lane.b32.xlu0 %v1408_v14, %s1520_s2  ;;  %v555_v54 = vrot.slane %v1846_v0, 3  ;;  %v1433_v61 = vpack.i.bf16 %v386_v49, %v384_v48 }
 0x171   :  { %v389_v58 = vrot.slane %v1855_v57, 1  ;;  %v471_v59 = vrot.slane %v1855_v57, 2  ;;  %v553_v60 = vrot.slane %v1855_v57, 3  ;;  %v466_v63 = vsel %vm451_vm1, %v463_v11, %v465_v7 }
 0x172   :  { %v468_v1 = vsel %vm451_vm1, %v465_v7, %v467_v35  ;;  %v548_v2 = vsel %vm533_vm5, %v545_v12, %v547_v9  ;;  %v550_v10 = vsel %vm533_vm5, %v547_v9, %v549_v36  ;;  %v470_v13 = vsel %vm451_vm1, %v467_v35, %v469_v28 }
 0x173   :  { %v1865_v3 = vpop.f32.mrb[12].mxu0  ;;  %v1438_v6 = vpack.i.bf16 %v468_v1, %v466_v63  ;;  %v472_v14 = vsel %vm451_vm1, %v469_v28, %v471_v59  ;;  %1424 = vrot.lane.b32.xlu1 %v1423_v37, %s1520_s2  ;;  %v1443_v23 = vpack.i.bf16 %v550_v10, %v548_v2  ;;  %v388_v35 = vsel %vm369_vm4, %v385_v31, %v387_v26 }
 0x174   :  { %v395_v11 = vrot.slane %v1865_v3, 1  ;;  %v477_v7 = vrot.slane %v1865_v3, 2  ;;  %v1875_v12 = vpop.f32.mrb[13].mxu0  ;;  %1419 = vrot.lane.b32.xlu0 %v1418_v46, %s1521_s8  ;;  %v559_v9 = vrot.slane %v1865_v3, 3  ;;  %v1453_v28 = vpack.i.bf16 %v472_v14, %v470_v13 }
 0x175   :  { %v393_v19 = vrot.slane %v1875_v12, 1  ;;  %v475_v21 = vrot.slane %v1875_v12, 2  ;;  %v557_v22 = vrot.slane %v1875_v12, 3  ;;  %v390_v37 = vsel %vm369_vm4, %v387_v26, %v389_v58 }
 0x176   :  { %v1448_v41 = vpack.i.bf16 %v390_v37, %v388_v35  ;;  %v1887_v42 = vsel %vm533_vm5, %v549_v36, %v551_v30  ;;  %v1890_v46 = vsel %vm533_vm5, %v551_v30, %v553_v60  ;;  %v392_v48 = vsel %vm369_vm4, %v389_v58, %v391_v51 }
 0x177   :  { %v1884_v39 = vpop.f32.mrb[14].mxu0  ;;  %v638_v63 = vrot.slane %v1875_v12, 4  ;;  %1434 = vrot.lane.b32.xlu1 %v1433_v61, %s1521_s8  ;;  %v1458_v10 = vpack.i.bf16 %v1890_v46, %v1887_v42  ;;  %v394_v61 = vsel %vm369_vm4, %v391_v51, %v393_v19  ;;  %v474_v13 = vsel %vm451_vm1, %v471_v59, %v473_v56 }
 0x178   :  { %v399_v31 = vrot.slane %v1884_v39, 1  ;;  %v481_v26 = vrot.slane %v1884_v39, 2  ;;  %v1898_v1 = vpop.f32.mrb[15].mxu0  ;;  %1429 = vrot.lane.b32.xlu0 %v1428_v47, %s1522_s9  ;;  %v563_v36 = vrot.slane %v1884_v39, 3  ;;  %v476_v14 = vsel %vm451_vm1, %v473_v56, %v475_v21 }
 0x179   :  { %v397_v30 = vrot.slane %v1898_v1, 1  ;;  %v479_v58 = vrot.slane %v1898_v1, 2  ;;  %v561_v2 = vrot.slane %v1898_v1, 3  ;;  %v1463_v35 = vpack.i.bf16 %v394_v61, %v392_v48 }
 0x17a   :  { %v1468_v37 = vpack.i.bf16 %v476_v14, %v474_v13  ;;  %v556_v47 = vsel %vm533_vm5, %v553_v60, %v555_v54  ;;  %v558_v40 = vsel %vm533_vm5, %v555_v54, %v557_v22  ;;  %v478_v15 = vsel %vm451_vm1, %v475_v21, %v477_v7 }
 0x17b   :  { %1444 = vrot.lane.b32.xlu1 %v1443_v23, %s1522_s9  ;;  %v1473_v49 = vpack.i.bf16 %v558_v40, %v556_v47  ;;  %v480_v17 = vsel %vm451_vm1, %v477_v7, %v479_v58  ;;  %v396_v42 = vsel %vm369_vm4, %v393_v19, %v395_v11  ;;  %v398_v56 = vsel %vm369_vm4, %v395_v11, %v397_v30 }
 0x17c   :  { %1439 = vrot.lane.b32.xlu0 %v1438_v6, %s1520_s2  ;;  %v1483_v51 = vpack.i.bf16 %v480_v17, %v478_v15  ;;  %v400_v59 = vsel %vm369_vm4, %v397_v30, %v399_v31  ;;  %v402_v60 = vsel %vm369_vm4, %v399_v31, %v1765_v33  ;;  %v1478_v54 = vpack.i.bf16 %v398_v56, %v396_v42 }
 0x17d   :  { %v1493_v46 = vpack.i.bf16 %v402_v60, %v400_v59  ;;  %v560_v40 = vsel %vm533_vm5, %v557_v22, %v559_v9  ;;  %v562_v21 = vsel %vm533_vm5, %v559_v9, %v561_v2  ;;  %v564_v7 = vsel %vm533_vm5, %v561_v2, %v563_v36 }
 0x17e   :  { %v1488_v23 = vpack.i.bf16 %v562_v21, %v560_v40  ;;  %v566_v6 = vsel %vm533_vm5, %v563_v36, %v1768_v34  ;;  %v482_v15 = vsel %vm451_vm1, %v479_v58, %v481_v26  ;;  %v644_v17 = vrot.slane %v1884_v39, 4 }
 0x17f   :  { %v642_v11 = vrot.slane %v1898_v1, 4  ;;  %1454 = vrot.lane.b32.xlu1 %v1453_v28, %s1520_s2  ;;  %v1503_v33 = vpack.i.bf16 %v566_v6, %v564_v7  ;;  %v484_v19 = vsel %vm451_vm1, %v481_v26, %v1781_v43  ;;  %v1938_v34 = vsel %vm203_vm0, %v618_v38, %v620_v50 }
 0x180   :  { %1449 = vrot.lane.b32.xlu0 %v1448_v41, %s1521_s8  ;;  %v1498_v9 = vpack.i.bf16 %v484_v19, %v482_v15  ;;  %v1945_v22 = vsel %vm203_vm0, %v620_v50, %v622_v5  ;;  %v1952_v43 = vsel %vm203_vm0, %v622_v5, %v624_v4  ;;  %v1961_v38 = vsel %vm203_vm0, %v624_v4, %v626_v25 }
 0x181   :  { %v718_v28 = vpack.c.bf16 %v1945_v22, %v1938_v34  ;;  %v1968_v50 = vsel %vm203_vm0, %v626_v25, %v628_v24  ;;  %v1975_v5 = vsel %vm203_vm0, %v628_v24, %v630_v55  ;;  %v720_v41 = vpack.c.bf16 %v1961_v38, %v1952_v43 }
 0x182   :  { %v722_v4 = vpack.c.bf16 %v1975_v5, %v1968_v50  ;;  %v1986_v25 = vsel %vm203_vm0, %v630_v55, %v632_v52  ;;  %v2247_v48 = vrot.slane %v1855_v57, 4  ;;  %v2248_v26 = vrot.slane %v1846_v0, 4 }
 0x183   :  { %1464 = vrot.lane.b32.xlu1 %v1463_v35, %s1521_s8  ;;  %v2024_v35 = vsel %vm203_vm0, %v642_v11, %v644_v17  ;;  %v2028_v47 = vsel %vm203_vm0, %v644_v17, %v1784_v44 }
 0x184   :  { %v1993_v24 = vsel %vm203_vm0, %v632_v52, %v2247_v48  ;;  %v2249_v36 = vmov %v2247_v48  ;;  %v2250_v55 = vmov %v2248_v26  ;;  %v2251_v52 = vrot.slane %v1865_v3, 4  ;;  %1459 = vrot.lane.b32.xlu0 %v1458_v10, %s1522_s9 }
 0x185   :  { %v724_v31 = vpack.c.bf16 %v1993_v24, %v1986_v25  ;;  %v2003_v30 = vsel %vm203_vm0, %v2249_v36, %v2248_v26  ;;  %v2008_v58 = vsel %vm203_vm0, %v2250_v55, %v638_v63  ;;  %v730_v10 = vpack.c.bf16 %v2028_v47, %v2024_v35  ;;  %v1048_v35 = vld [vmem:[%s2241_s5 + $0x18] sm:$0xff] }
 0x186   :  { %v2013_v2 = vsel %vm203_vm0, %v638_v63, %v2251_v52  ;;  %v726_v61 = vpack.c.bf16 %v2008_v58, %v2003_v30  ;;  %v2252_v13 = vmov %v2251_v52 }
 0x187   :  { %v2021_v14 = vsel %vm203_vm0, %v2252_v13, %v642_v11  ;;  %1474 = vrot.lane.b32.xlu1 %v1473_v49, %s1522_s9  ;;  %vm681_vm0 = vcmask 523264  }
 0x188   :  { %v728_v63 = vpack.c.bf16 %v2021_v14, %v2013_v2  ;;  %1469 = vrot.lane.b32.xlu0 %v1468_v37, %s1520_s2  ;;  %v1047_v14 = vld [vmem:[%s2241_s5 + $0x10] sm:$0xff] }
 0x189   :  { %v1365_v47 = vpack.c.bf16 %v1048_v35, %v1047_v14 }
 0x18b   :  { %1484 = vrot.lane.b32.xlu1 %v1483_v51, %s1520_s2 }
 0x18c   :  { %1479 = vrot.lane.b32.xlu0 %v1478_v54, %s1521_s8 }
 0x18f   :  { %1494 = vrot.lane.b32.xlu1 %v1493_v46, %s1521_s8 }
 0x190   :  { %1489 = vrot.lane.b32.xlu0 %v1488_v23, %s1522_s9 }
 0x193   :  { %1504 = vrot.lane.b32.xlu1 %v1503_v33, %s1522_s9 }
 0x194   :  { %1499 = vrot.lane.b32.xlu0 %v1498_v9, %s1520_s2 }
 0x1d9   :  { %v1395_v44 = vpop.permute.xlu1 %1394 }
 0x1da   :  { %v1390_v42 = vpop.permute.xlu0 %1389  ;;  %v1397_v60 = vunpack.i.h.bf16 %v1395_v44  ;;  %v1396_v49 = vunpack.i.l.bf16 %v1395_v44 }
 0x1db   :  { %v1392_v56 = vunpack.i.h.bf16 %v1390_v42  ;;  %v1391_v59 = vunpack.i.l.bf16 %v1390_v42 }
 0x1dd   :  { %v666_v37 = vsel %vm664_vm6, %v1739_v16, %v1392_v56  ;;  %v665_v51 = vsel %vm664_vm6, %v1744_v20, %v1391_v59  ;;  %v1405_v54 = vpop.permute.xlu1 %1404 }
 0x1de   :  { %v1400_v46 = vpop.permute.xlu0 %1399  ;;  %v1407_v23 = vunpack.i.h.bf16 %v1405_v54  ;;  %v1406_v7 = vunpack.i.l.bf16 %v1405_v54  ;;  %v682_v6 = vsel %vm681_vm0, %v665_v51, %v1396_v49  ;;  %v683_v15 = vsel %vm681_vm0, %v666_v37, %v1397_v60 }
 0x1df   :  { %v1402_v40 = vunpack.i.h.bf16 %v1400_v46  ;;  %v1401_v21 = vunpack.i.l.bf16 %v1400_v46 }
 0x1e0   :  { %v668_v48 = vsel %vm664_vm6, %v1754_v27, %v1407_v23  ;;  %v667_v26 = vsel %vm664_vm6, %v1762_v32, %v1406_v7 }
 0x1e1   :  { %v1415_v17 = vpop.permute.xlu1 %1414  ;;  %v699_v11 = vsel %vm698_vm7, %v682_v6, %v1401_v21  ;;  %v700_v16 = vsel %vm698_vm7, %v683_v15, %v1402_v40 }
 0x1e2   :  { %v1417_v33 = vunpack.i.h.bf16 %v1415_v17  ;;  %v1416_v19 = vunpack.i.l.bf16 %v1415_v17  ;;  %v1410_v20 = vpop.permute.xlu0 %1409  ;;  %v715_v9 = vpack.c.bf16 %v700_v16, %v699_v11 }
 0x1e3   :  { %v1412_v34 = vunpack.i.h.bf16 %v1410_v20  ;;  %v1411_v22 = vunpack.i.l.bf16 %v1410_v20 }
 0x1e4   :  { %875 = vmatmul.mubr.bf16.vlgmr.msra.gmra.mrb[0].mxu1 %v715_v9 }
 0x1e5   :  { %v685_v36 = vsel %vm681_vm0, %v668_v48, %v1412_v34  ;;  %v684_v55 = vsel %vm681_vm0, %v667_v26, %v1411_v22  ;;  %1209 = vmatprep.mubr.msk.bf16.mxu1 %vm664_vm6, %v718_v28  ;;  %v1425_v52 = vpop.permute.xlu1 %1424 }
 0x1e6   :  { %v1420_v13 = vpop.permute.xlu0 %1419  ;;  %v701_v44 = vsel %vm698_vm7, %v684_v55, %v1416_v19  ;;  %v702_v42 = vsel %vm698_vm7, %v685_v36, %v1417_v33  ;;  %v1427_v27 = vunpack.i.h.bf16 %v1425_v52  ;;  %v1426_v49 = vunpack.i.l.bf16 %v1425_v52 }
 0x1e7   :  { %v1422_v56 = vunpack.i.h.bf16 %v1420_v13  ;;  %v1421_v59 = vunpack.i.l.bf16 %v1420_v13  ;;  %v717_v60 = vpack.c.bf16 %v702_v42, %v701_v44 }
 0x1e9   :  { %v670_v32 = vsel %vm664_vm6, %v1786_v45, %v1422_v56  ;;  %v669_v37 = vsel %vm664_vm6, %v1798_v53, %v1421_v59  ;;  %v1435_v51 = vpop.permute.xlu1 %1434 }
 0x1ea   :  { %v1430_v54 = vpop.permute.xlu0 %1429  ;;  %v1437_v40 = vunpack.i.h.bf16 %v1435_v51  ;;  %v1436_v21 = vunpack.i.l.bf16 %v1435_v51  ;;  %v686_v23 = vsel %vm681_vm0, %v669_v37, %v1426_v49  ;;  %v687_v7 = vsel %vm681_vm0, %v670_v32, %v1427_v27 }
 0x1eb   :  { %v1432_v28 = vunpack.i.h.bf16 %v1430_v54  ;;  %v1431_v46 = vunpack.i.l.bf16 %v1430_v54 }
 0x1ec   :  { %883 = vmatmul.mubr.bf16.gmra.mrb[4].mxu1 %v717_v60  ;;  %v672_v20 = vsel %vm664_vm6, %v1805_v62, %v1437_v40  ;;  %v671_v9 = vsel %vm664_vm6, %v1817_v8, %v1436_v21 }
 0x1ed   :  { %1210 = vmatprep.mubr.msk.bf16.mxu1 %vm664_vm6, %v720_v41  ;;  %v1445_v45 = vpop.permute.xlu1 %1444  ;;  %v703_v6 = vsel %vm698_vm7, %v686_v23, %v1431_v46  ;;  %v704_v53 = vsel %vm698_vm7, %v687_v7, %v1432_v28 }
 0x1ee   :  { %v1447_v15 = vunpack.i.h.bf16 %v1445_v45  ;;  %v1446_v17 = vunpack.i.l.bf16 %v1445_v45  ;;  %v1440_v11 = vpop.permute.xlu0 %1439  ;;  %v719_v16 = vpack.c.bf16 %v704_v53, %v703_v6 }
 0x1ef   :  { %v1442_v33 = vunpack.i.h.bf16 %v1440_v11  ;;  %v1441_v19 = vunpack.i.l.bf16 %v1440_v11 }
 0x1f1   :  { %v689_v43 = vsel %vm681_vm0, %v672_v20, %v1442_v33  ;;  %v688_v38 = vsel %vm681_vm0, %v671_v9, %v1441_v19  ;;  %v1455_v41 = vpop.permute.xlu1 %1454 }
 0x1f2   :  { %v1450_v34 = vpop.permute.xlu0 %1449  ;;  %v705_v22 = vsel %vm698_vm7, %v688_v38, %v1446_v17  ;;  %v706_v48 = vsel %vm698_vm7, %v689_v43, %v1447_v15  ;;  %v1457_v52 = vunpack.i.h.bf16 %v1455_v41  ;;  %v1456_v13 = vunpack.i.l.bf16 %v1455_v41 }
 0x1f3   :  { %v1452_v26 = vunpack.i.h.bf16 %v1450_v34  ;;  %v1451_v36 = vunpack.i.l.bf16 %v1450_v34  ;;  %v721_v55 = vpack.c.bf16 %v706_v48, %v705_v22 }
 0x1f4   :  { %891 = vmatmul.mubr.bf16.gmra.mrb[8].mxu1 %v719_v16 }
 0x1f5   :  { %v674_v62 = vsel %vm664_vm6, %v1826_v18, %v1452_v26  ;;  %v673_v8 = vsel %vm664_vm6, %v1836_v29, %v1451_v36  ;;  %1211 = vmatprep.mubr.msk.bf16.mxu1 %vm664_vm6, %v722_v4  ;;  %v1465_v44 = vpop.permute.xlu1 %1464 }
 0x1f6   :  { %v1460_v42 = vpop.permute.xlu0 %1459  ;;  %v1467_v60 = vunpack.i.h.bf16 %v1465_v44  ;;  %v1466_v27 = vunpack.i.l.bf16 %v1465_v44  ;;  %v690_v49 = vsel %vm681_vm0, %v673_v8, %v1456_v13  ;;  %v691_v32 = vsel %vm681_vm0, %v674_v62, %v1457_v52  ;;  %v1046_v44 = vld [vmem:[%s2241_s5 + $0x8] sm:$0xff] }
 0x1f7   :  { %v1462_v56 = vunpack.i.h.bf16 %v1460_v42  ;;  %v1461_v59 = vunpack.i.l.bf16 %v1460_v42  ;;  %v1051_v42 = vld [vmem:[%s2241_s5 + $0x30] sm:$0xff] }
 0x1f8   :  { %v676_v46 = vsel %vm664_vm6, %v1846_v0, %v1467_v60  ;;  %v675_v40 = vsel %vm664_vm6, %v1855_v57, %v1466_v27  ;;  %v2253_v60 = vmov 0.0  }
 0x1f9   :  { %v1475_v37 = vpop.permute.xlu1 %1474  ;;  %v707_v18 = vsel %vm698_vm7, %v690_v49, %v1461_v59  ;;  %v708_v29 = vsel %vm698_vm7, %v691_v32, %v1462_v56  ;;  %v1052_v59 = vld [vmem:[%s2241_s5 + $0x38] sm:$0xff]  ;;  %1334 = vmatprep.mubr.msk.f32.mxu0 %vm1524_vm8, %v2253_v60  ;;  %v1053_v49 = vld [vmem:[%s2241_s5 + $0x40] sm:$0xff]  ;;  %v1054_v32 = vld [vmem:[%s2241_s5 + $0x48] sm:$0xff] }
 0x1fa   :  { %v1477_v51 = vunpack.i.h.bf16 %v1475_v37  ;;  %v1476_v54 = vunpack.i.l.bf16 %v1475_v37  ;;  %v1470_v50 = vpop.permute.xlu0 %1469  ;;  %v723_v5 = vpack.c.bf16 %v708_v29, %v707_v18  ;;  %v1371_v27 = vpack.c.bf16 %v1052_v59, %v1051_v42  ;;  %v1055_v18 = vld [vmem:[%s2241_s5 + $0x50] sm:$0xff]  ;;  %v1056_v29 = vld [vmem:[%s2241_s5 + $0x58] sm:$0xff] }
 0x1fb   :  { %v1472_v4 = vunpack.i.h.bf16 %v1470_v50  ;;  %v1471_v28 = vunpack.i.l.bf16 %v1470_v50  ;;  %v1374_v37 = vpack.c.bf16 %v1054_v32, %v1053_v49 }
 0x1fc   :  { %899 = vmatmul.mubr.bf16.gmra.mrb[12].mxu1 %v721_v55 }
 0x1fd   :  { %v693_v21 = vsel %vm681_vm0, %v676_v46, %v1472_v4  ;;  %v692_v23 = vsel %vm681_vm0, %v675_v40, %v1471_v28  ;;  %1212 = vmatprep.mubr.msk.bf16.mxu1 %vm664_vm6, %v724_v31  ;;  %v1485_v7 = vpop.permute.xlu1 %1484  ;;  %v2177_v28 = vld [vmem:[%s2243_s4] sm:$0xff] }
 0x1fe   :  { %v1480_v45 = vpop.permute.xlu0 %1479  ;;  %v709_v6 = vsel %vm698_vm7, %v692_v23, %v1476_v54  ;;  %v710_v53 = vsel %vm698_vm7, %v693_v21, %v1477_v51  ;;  %v1487_v57 = vunpack.i.h.bf16 %v1485_v7  ;;  %v1486_v11 = vunpack.i.l.bf16 %v1485_v7  ;;  %v2171_v54 = vld [vmem:[%s2242_s3] ss:$0 sm:$0xff]  ;;  %v2183_v7 = vld [vmem:[%s2243_s4 + $0x8] sm:$0xff] }
 0x1ff   :  { %v1482_v0 = vunpack.i.h.bf16 %v1480_v45  ;;  %v1481_v15 = vunpack.i.l.bf16 %v1480_v45  ;;  %v725_v17 = vpack.c.bf16 %v710_v53, %v709_v6  ;;  %v1377_v51 = vpack.c.bf16 %v1056_v29, %v1055_v18 }
 0x201   :  { %v678_v16 = vsel %vm664_vm6, %v1865_v3, %v1482_v0  ;;  %v677_v33 = vsel %vm664_vm6, %v1875_v12, %v1481_v15  ;;  %v1495_v25 = vpop.permute.xlu1 %1494 }
 0x202   :  { %v1490_v24 = vpop.permute.xlu0 %1489  ;;  %v1497_v20 = vunpack.i.h.bf16 %v1495_v25  ;;  %v1496_v9 = vunpack.i.l.bf16 %v1495_v25  ;;  %v694_v43 = vsel %vm681_vm0, %v677_v33, %v1486_v11  ;;  %v695_v38 = vsel %vm681_vm0, %v678_v16, %v1487_v57 }
 0x203   :  { %v1492_v31 = vunpack.i.h.bf16 %v1490_v24  ;;  %v1491_v19 = vunpack.i.l.bf16 %v1490_v24 }
 0x204   :  { %907 = vmatmul.mubr.bf16.gmra.mrb[16].mxu1 %v723_v5  ;;  %v680_v52 = vsel %vm664_vm6, %v1884_v39, %v1497_v20  ;;  %v679_v13 = vsel %vm664_vm6, %v1898_v1, %v1496_v9  ;;  %v1523_v39 = vmov 0.0|0.0   ;;  %v1045_v1 = vld [vmem:[%s2241_s5] sm:$0xff] }
 0x205   :  { %1213 = vmatprep.mubr.msk.bf16.mxu1 %vm664_vm6, %v726_v61  ;;  %v1505_v3 = vpop.permute.xlu1 %1504  ;;  %v711_v41 = vsel %vm698_vm7, %v694_v43, %v1491_v19  ;;  %v712_v12 = vsel %vm698_vm7, %v695_v38, %v1492_v31  ;;  %1361 = vmatprep.subr.bf16.mxu0 %v1523_v39  ;;  %v1362_v2 = vpack.c.bf16 %v1046_v44, %v1045_v1 }
 0x206   :  { %v1507_v34 = vunpack.i.h.bf16 %v1505_v3  ;;  %v1506_v22 = vunpack.i.l.bf16 %v1505_v3  ;;  %v1500_v48 = vpop.permute.xlu0 %1499  ;;  %v727_v26 = vpack.c.bf16 %v712_v12, %v711_v41 }
 0x207   :  { %v1502_v36 = vunpack.i.h.bf16 %v1500_v48  ;;  %v1501_v55 = vunpack.i.l.bf16 %v1500_v48  ;;  %1363 = vmatpush3.bf16.msra.mxu0 %v1362_v2 }
 0x208   :  { %1364 = vmatprep.subr.bf16.mxu0 %v1523_v39 }
 0x209   :  { %v697_v30 = vsel %vm681_vm0, %v680_v52, %v1502_v36  ;;  %v696_v58 = vsel %vm681_vm0, %v679_v13, %v1501_v55 }
 0x20a   :  { %v713_v61 = vsel %vm698_vm7, %v696_v58, %v1506_v22  ;;  %v714_v62 = vsel %vm698_vm7, %v697_v30, %v1507_v34 }
 0x20b   :  { %v729_v8 = vpack.c.bf16 %v714_v62, %v713_v61  ;;  %1366 = vmatpush3.bf16.msra.mxu0 %v1365_v47 }
 0x20c   :  { %915 = vmatmul.mubr.bf16.gmra.mrb[20].mxu1 %v725_v17  ;;  %1367 = vmatprep.subr.bf16.mxu0 %v1523_v39 }
 0x20d   :  { %1214 = vmatprep.mubr.msk.bf16.mxu1 %vm664_vm6, %v728_v63  ;;  %v1049_v63 = vld [vmem:[%s2241_s5 + $0x20] sm:$0xff] }
 0x214   :  { %923 = vmatmul.mubr.bf16.gmra.mrb[24].mxu1 %v727_v26 }
 0x215   :  { %1215 = vmatprep.mubr.msk.bf16.mxu1 %vm664_vm6, %v730_v10  ;;  %v1050_v10 = vld [vmem:[%s2241_s5 + $0x28] sm:$0xff] }
 0x216   :  { %v1368_v56 = vpack.c.bf16 %v1050_v10, %v1049_v63 }
 0x218   :  { %1369 = vmatpush3.bf16.msra.mxu0 %v1368_v56 }
 0x219   :  { %1370 = vmatprep.subr.bf16.mxu0 %v1523_v39 }
 0x21c   :  { %931 = vmatmul.mubr.bf16.gmra.mrb[28].mxu1 %v729_v8  ;;  %1372 = vmatpush3.bf16.msra.mxu0 %v1371_v27 }
 0x21d   :  { %1373 = vmatprep.subr.bf16.mxu0 %v1523_v39 }
 0x220   :  { %1375 = vmatpush3.bf16.msra.mxu0 %v1374_v37 }
 0x221   :  { %1376 = vmatprep.subr.bf16.mxu0 %v1523_v39 }
 0x224   :  { %1378 = vmatpush3.bf16.msra.mxu0 %v1377_v51 }
 0x2b7   :  { %v876_v50 = vpop.f32.mrb[0].mxu1 }
 0x2b8   :  { %v877_v5 = vadd.f32 %v2171_v54, %v876_v50  ;;  %v878_v4 = vpop.f32.mrb[1].mxu1 }
 0x2b9   :  { %v879_v46 = vpop.f32.mrb[2].mxu1 }
 0x2ba   :  { %v939_v40 = vmax.f32 %v877_v5, 0.0  ;;  %v880_v21 = vadd.f32 %v2171_v54, %v879_v46  ;;  %v881_v23 = vpop.f32.mrb[3].mxu1 }
 0x2bc   :  { %v957_v45 = vmul.f32 %v2177_v28, %v939_v40  ;;  %v940_v6 = vmax.f32 %v880_v21, 0.0 }
 0x2be   :  { %v958_v53 = vmul.f32 %v2183_v7, %v940_v6  ;;  %v973_v15 = vsel %vm698_vm7, %v957_v45, -inf }
 0x2bf   :  { %v884_v0 = vpop.f32.mrb[4].mxu1 }
 0x2c0   :  { %v974_v17 = vsel %vm698_vm7, %v958_v53, -inf  ;;  %v885_v57 = vadd.f32 %v2171_v54, %v884_v0  ;;  %v886_v11 = vpop.f32.mrb[5].mxu1 }
 0x2c1   :  { %v975_v16 = vmax.f32 %v973_v15, %v974_v17  ;;  %v887_v33 = vpop.f32.mrb[6].mxu1 }
 0x2c2   :  { %v941_v25 = vmax.f32 %v885_v57, 0.0  ;;  %v888_v24 = vadd.f32 %v2171_v54, %v887_v33  ;;  %v889_v31 = vpop.f32.mrb[7].mxu1 }
 0x2c3   :  { %v976_v19 = vrot.slane %v975_v16, 4 }
 0x2c4   :  { %v959_v20 = vmul.f32 %v2177_v28, %v941_v25  ;;  %v942_v9 = vmax.f32 %v888_v24, 0.0 }
 0x2c5   :  { %v977_v43 = vmax.f32 %v975_v16, %v976_v19 }
 0x2c6   :  { %v960_v38 = vmul.f32 %v2183_v7, %v942_v9  ;;  %v982_v41 = vsel %vm698_vm7, %v959_v20, -inf }
 0x2c7   :  { %v892_v3 = vpop.f32.mrb[8].mxu1  ;;  %v978_v48 = vrot.slane %v977_v43, 2 }
 0x2c8   :  { %v983_v12 = vsel %vm698_vm7, %v960_v38, -inf  ;;  %v893_v34 = vadd.f32 %v2171_v54, %v892_v3  ;;  %v894_v22 = vpop.f32.mrb[9].mxu1 }
 0x2c9   :  { %v984_v26 = vmax.f32 %v982_v41, %v983_v12  ;;  %v895_v36 = vpop.f32.mrb[10].mxu1  ;;  %v979_v62 = vmax.f32 %v977_v43, %v978_v48 }
 0x2ca   :  { %v943_v55 = vmax.f32 %v893_v34, 0.0  ;;  %v896_v52 = vadd.f32 %v2171_v54, %v895_v36  ;;  %v897_v13 = vpop.f32.mrb[11].mxu1 }
 0x2cb   :  { %v985_v30 = vrot.slane %v984_v26, 4  ;;  %v980_v63 = vrot.slane %v979_v62, 1 }
 0x2cc   :  { %v961_v58 = vmul.f32 %v2177_v28, %v943_v55  ;;  %v944_v61 = vmax.f32 %v896_v52, 0.0 }
 0x2cd   :  { %v986_v8 = vmax.f32 %v984_v26, %v985_v30  ;;  %v981_v29 = vmax.f32 %v979_v62, %v980_v63 }
 0x2ce   :  { %v962_v39 = vmul.f32 %v2183_v7, %v944_v61  ;;  %v991_v2 = vsel %vm698_vm7, %v961_v58, -inf }
 0x2cf   :  { %v987_v1 = vrot.slane %v986_v8, 2  ;;  %v900_v44 = vpop.f32.mrb[12].mxu1 }
 0x2d0   :  { %v992_v14 = vsel %vm698_vm7, %v962_v39, -inf  ;;  %v901_v35 = vadd.f32 %v2171_v54, %v900_v44  ;;  %v902_v47 = vpop.f32.mrb[13].mxu1 }
 0x2d1   :  { %v988_v10 = vmax.f32 %v986_v8, %v987_v1  ;;  %v993_v42 = vmax.f32 %v991_v2, %v992_v14  ;;  %v903_v56 = vpop.f32.mrb[14].mxu1 }
 0x2d2   :  { %v945_v59 = vmax.f32 %v901_v35, 0.0  ;;  %v904_v60 = vadd.f32 %v2171_v54, %v903_v56  ;;  %v905_v27 = vpop.f32.mrb[15].mxu1 }
 0x2d3   :  { %v989_v49 = vrot.slane %v988_v10, 1  ;;  %v994_v32 = vrot.slane %v993_v42, 4 }
 0x2d4   :  { %v963_v37 = vmul.f32 %v2177_v28, %v945_v59  ;;  %v946_v18 = vmax.f32 %v904_v60, 0.0 }
 0x2d5   :  { %v990_v51 = vmax.f32 %v988_v10, %v989_v49  ;;  %v995_v50 = vmax.f32 %v993_v42, %v994_v32 }
 0x2d6   :  { %v964_v5 = vmul.f32 %v2183_v7, %v946_v18  ;;  %v1000_v21 = vsel %vm698_vm7, %v963_v37, -inf }
 0x2d7   :  { %v1073_v4 = vsel %vm1072_vm9, %v990_v51, %v981_v29  ;;  %v996_v46 = vrot.slane %v995_v50, 2  ;;  %v908_v40 = vpop.f32.mrb[16].mxu1 }
 0x2d8   :  { %v1001_v23 = vsel %vm698_vm7, %v964_v5, -inf  ;;  %v909_v45 = vadd.f32 %v2171_v54, %v908_v40  ;;  %v910_v6 = vpop.f32.mrb[17].mxu1 }
 0x2d9   :  { %v997_v53 = vmax.f32 %v995_v50, %v996_v46  ;;  %v1002_v0 = vmax.f32 %v1000_v21, %v1001_v23  ;;  %v911_v15 = vpop.f32.mrb[18].mxu1 }
 0x2da   :  { %v947_v17 = vmax.f32 %v909_v45, 0.0  ;;  %v912_v57 = vadd.f32 %v2171_v54, %v911_v15  ;;  %v913_v11 = vpop.f32.mrb[19].mxu1 }
 0x2db   :  { %v998_v16 = vrot.slane %v997_v53, 1  ;;  %v1003_v33 = vrot.slane %v1002_v0, 4 }
 0x2dc   :  { %v965_v25 = vmul.f32 %v2177_v28, %v947_v17  ;;  %v948_v24 = vmax.f32 %v912_v57, 0.0 }
 0x2dd   :  { %v999_v31 = vmax.f32 %v997_v53, %v998_v16  ;;  %v1004_v19 = vmax.f32 %v1002_v0, %v1003_v33 }
 0x2de   :  { %v966_v20 = vmul.f32 %v2183_v7, %v948_v24  ;;  %v1009_v3 = vsel %vm698_vm7, %v965_v25, -inf }
 0x2df   :  { %v1075_v9 = vsel %vm1074_vm10, %v999_v31, %v1073_v4  ;;  %v1005_v43 = vrot.slane %v1004_v19, 2  ;;  %v916_v38 = vpop.f32.mrb[20].mxu1 }
 0x2e0   :  { %v1010_v41 = vsel %vm698_vm7, %v966_v20, -inf  ;;  %v917_v12 = vadd.f32 %v2171_v54, %v916_v38  ;;  %v918_v34 = vpop.f32.mrb[21].mxu1 }
 0x2e1   :  { %v1006_v22 = vmax.f32 %v1004_v19, %v1005_v43  ;;  %v1011_v48 = vmax.f32 %v1009_v3, %v1010_v41  ;;  %v919_v26 = vpop.f32.mrb[22].mxu1 }
 0x2e2   :  { %v949_v36 = vmax.f32 %v917_v12, 0.0  ;;  %v920_v55 = vadd.f32 %v2171_v54, %v919_v26  ;;  %v921_v52 = vpop.f32.mrb[23].mxu1 }
 0x2e3   :  { %v1007_v13 = vrot.slane %v1006_v22, 1  ;;  %v1012_v30 = vrot.slane %v1011_v48, 4  ;;  %v1216_v52 = vld [vmem:[%s2244_s6] ss:$0 sm:$0xff] }
 0x2e4   :  { %v967_v58 = vmul.f32 %v2177_v28, %v949_v36  ;;  %v950_v61 = vmax.f32 %v920_v55, 0.0 }
 0x2e5   :  { %v1008_v62 = vmax.f32 %v1006_v22, %v1007_v13  ;;  %v1013_v8 = vmax.f32 %v1011_v48, %v1012_v30 }
 0x2e6   :  { %v968_v39 = vmul.f32 %v2183_v7, %v950_v61  ;;  %v1018_v14 = vsel %vm698_vm7, %v967_v58, -inf }
 0x2e7   :  { %v1077_v1 = vsel %vm1076_vm11, %v1008_v62, %v1075_v9  ;;  %v1014_v44 = vrot.slane %v1013_v8, 2  ;;  %v924_v2 = vpop.f32.mrb[24].mxu1 }
 0x2e8   :  { %v1019_v35 = vsel %vm698_vm7, %v968_v39, -inf  ;;  %v925_v47 = vadd.f32 %v2171_v54, %v924_v2  ;;  %v926_v63 = vpop.f32.mrb[25].mxu1 }
 0x2e9   :  { %v1015_v10 = vmax.f32 %v1013_v8, %v1014_v44  ;;  %v1020_v42 = vmax.f32 %v1018_v14, %v1019_v35  ;;  %v927_v56 = vpop.f32.mrb[26].mxu1 }
 0x2ea   :  { %v951_v59 = vmax.f32 %v925_v47, 0.0  ;;  %v928_v60 = vadd.f32 %v2171_v54, %v927_v56  ;;  %v929_v27 = vpop.f32.mrb[27].mxu1 }
 0x2eb   :  { %v1016_v49 = vrot.slane %v1015_v10, 1  ;;  %v1021_v32 = vrot.slane %v1020_v42, 4 }
 0x2ec   :  { %v969_v37 = vmul.f32 %v2177_v28, %v951_v59  ;;  %v952_v18 = vmax.f32 %v928_v60, 0.0 }
 0x2ed   :  { %v1017_v29 = vmax.f32 %v1015_v10, %v1016_v49  ;;  %v1022_v51 = vmax.f32 %v1020_v42, %v1021_v32 }
 0x2ee   :  { %v970_v50 = vmul.f32 %v2183_v7, %v952_v18  ;;  %v1027_v40 = vsel %vm698_vm7, %v969_v37, -inf }
 0x2ef   :  { %v1023_v5 = vrot.slane %v1022_v51, 2  ;;  %v932_v4 = vpop.f32.mrb[28].mxu1  ;;  %v1079_v46 = vsel %vm1078_vm12, %v1017_v29, %v1077_v1 }
 0x2f0   :  { %v1028_v21 = vsel %vm698_vm7, %v970_v50, -inf  ;;  %v933_v23 = vadd.f32 %v2171_v54, %v932_v4  ;;  %v934_v45 = vpop.f32.mrb[29].mxu1 }
 0x2f1   :  { %v1024_v6 = vmax.f32 %v1022_v51, %v1023_v5  ;;  %v1029_v53 = vmax.f32 %v1027_v40, %v1028_v21  ;;  %v935_v0 = vpop.f32.mrb[30].mxu1 }
 0x2f2   :  { %v953_v15 = vmax.f32 %v933_v23, 0.0  ;;  %v936_v17 = vadd.f32 %v2171_v54, %v935_v0  ;;  %v937_v57 = vpop.f32.mrb[31].mxu1 }
 0x2f3   :  { %v1025_v11 = vrot.slane %v1024_v6, 1  ;;  %v1030_v16 = vrot.slane %v1029_v53, 4 }
 0x2f4   :  { %v971_v33 = vmul.f32 %v2177_v28, %v953_v15  ;;  %v954_v25 = vmax.f32 %v936_v17, 0.0 }
 0x2f5   :  { %v1026_v24 = vmax.f32 %v1024_v6, %v1025_v11  ;;  %v1031_v31 = vmax.f32 %v1029_v53, %v1030_v16 }
 0x2f6   :  { %v972_v19 = vmul.f32 %v2183_v7, %v954_v25  ;;  %v1036_v43 = vsel %vm698_vm7, %v971_v33, -inf }
 0x2f7   :  { %v1032_v20 = vrot.slane %v1031_v31, 2  ;;  %v1081_v9 = vsel %vm1080_vm13, %v1026_v24, %v1079_v46 }
 0x2f8   :  { %v1037_v38 = vsel %vm698_vm7, %v972_v19, -inf }
 0x2f9   :  { %v1033_v3 = vmax.f32 %v1031_v31, %v1032_v20  ;;  %v1038_v41 = vmax.f32 %v1036_v43, %v1037_v38 }
 0x2fb   :  { %v1034_v54 = vrot.slane %v1033_v3, 1  ;;  %v1039_v12 = vrot.slane %v1038_v41, 4 }
 0x2fd   :  { %v1035_v34 = vmax.f32 %v1033_v3, %v1034_v54  ;;  %v1040_v22 = vmax.f32 %v1038_v41, %v1039_v12 }
 0x2ff   :  { %v1041_v28 = vrot.slane %v1040_v22, 2  ;;  %v1083_v48 = vsel %vm1082_vm14, %v1035_v34, %v1081_v9 }
 0x301   :  { %v1042_v26 = vmax.f32 %v1040_v22, %v1041_v28 }
 0x303   :  { %v1043_v36 = vrot.slane %v1042_v26, 1 }
 0x305   :  { %v1044_v55 = vmax.f32 %v1042_v26, %v1043_v36 }
 0x307   :  { %v1085_v7 = vsel %vm1084_vm15, %v1044_v55, %v1083_v48 }
 0x308   :  { %1335 = vmatmul.mubr.msk.f32.vlgmr.msra.gmra.mrb[16].mxu0 %vm698_vm7, %v1085_v7 }
 0x3db   :  { %v1154_v13 = vpop.f32.mrb[16].mxu0 }
 0x3dc   :  { %v1155_v30 = vadd.f32 %v1216_v52, %v1154_v13  ;;  %v1336_v58 = vpop.f32.mrb[17].mxu0 }
 0x3de   :  { %1159 = vst.msk [vmem:[%s2245_s7] sm:$0xff] %vm1158_vm2, %v1155_v30 }

</bundles_post_ra>
